<compile_context>
chip_gen: v7x
topology: tpu7x:2x2x1
jax: 0.10.0
libtpu: 0.0.40
codegen_flags: <defaults>
</compile_context>

<pallas_src>
import functools

import jax
import jax.numpy as jnp
from jax import lax
from jax.experimental import pallas as pl
from jax.experimental.pallas import tpu as pltpu


def appnp_kernel(x_ref, w1t_ref, b1_ref, w2t_ref, b2_ref, a_hbm_ref, out_ref,
                 a_vmem, a_sem, *, K, alpha):
    # NOTE: F.dropout(x, training=False) is identity -> not emitted.

    # Kick off the (large) A_hat HBM->VMEM DMA first so it overlaps with the
    # two linear layers below (manual P4-style copy; A bypasses BlockSpec).
    a_copy = pltpu.make_async_copy(a_hbm_ref, a_vmem, a_sem)
    a_copy.start()

    # lin1 + relu: h = relu(x @ W1^T + b1)          [N, H]  (bf16 MXU, f32 acc)
    h = jnp.dot(x_ref[...], w1t_ref[...],
                preferred_element_type=jnp.float32) + b1_ref[...]
    h = jnp.maximum(h, 0.0)

    # lin2: z0 = h @ W2^T + b2                      [N, C]
    z0 = jnp.dot(h.astype(jnp.bfloat16), w2t_ref[...],
                 preferred_element_type=jnp.float32) + b2_ref[...]

    a_copy.wait()  # A_hat now resident in VMEM

    # APPNP propagation in the [N, C] layout so the small z matrix is the MXU
    # weight-stationary (RHS) operand and A's rows are streamed as LHS:
    #     z_{k+1} = (1 - alpha) * (A_hat @ z_k) + alpha * z0
    # (1 - alpha) is applied in-kernel on the tiny [N, C] product (VPU work
    # hidden under the MXU), never as a wrapper-side pass over O(N^2) A.
    az0 = alpha * z0               # loop-invariant, computed once
    scale = 1.0 - alpha

    def step(z):
        p = jnp.dot(a_vmem[...], z.astype(a_vmem.dtype),
                    preferred_element_type=jnp.float32)
        return p * scale + az0

    z = z0
    if K <= 8:
        # Static K -> fully unrolled, the LLO scheduler sees every MXU push.
        for _ in range(K):
            z = step(z)
    else:
        z = lax.fori_loop(0, K, lambda _, zz: step(zz), z, unroll=True)

    # log_softmax over the class axis (axis 1), numerically stable, f32.
    z = z - jnp.max(z, axis=1, keepdims=True)
    lse = jnp.log(jnp.sum(jnp.exp(z), axis=1, keepdims=True))
    out_ref[...] = (z - lse).astype(out_ref.dtype)


def _vmem_limit_bytes():
    """~85% of physical per-core VMEM (headroom for compiler scratch)."""
    cap = None
    try:
        info = pltpu.get_tpu_info()
        cap = getattr(info, "vmem_capacity_bytes", None)
        if cap is None:
            cap = getattr(info, "vmem_size_bytes", None)
    except Exception:
        cap = None
    if not cap:
        cap = 64 * 1024 * 1024  # conservative fallback: v7x per-TC physical VMEM
    return int(cap) * 85 // 100


def appnp_forward(x, W1, b1, W2, b2, a_hat, *, K, alpha):
    """x: [N, F]; W1: [H, F]; b1: [H]; W2: [C, H]; b2: [C]; a_hat: [N, N]."""
    N, F = x.shape
    H = W1.shape[0]
    C = W2.shape[0]

    # bf16 MXU operands (tiny one-time casts; A would normally be stored bf16).
    x_bf = x.astype(jnp.bfloat16)              # [N, F]
    w1t = W1.T.astype(jnp.bfloat16)            # [F, H]
    w2t = W2.T.astype(jnp.bfloat16)            # [H, C]
    a_bf = a_hat.astype(jnp.bfloat16)          # [N, N]

    kernel = functools.partial(appnp_kernel, K=int(K), alpha=float(alpha))
    vmem = pl.BlockSpec(memory_space=pltpu.MemorySpace.VMEM)

    flops = 2 * N * F * H + 2 * N * H * C + 2 * int(K) * N * N * C
    bytes_accessed = (N * F + F * H + H * C + N * N) * 2 + (H + C) * 4 + N * C * 4

    return pl.pallas_call(
        kernel,
        out_shape=jax.ShapeDtypeStruct((N, C), jnp.float32),
        in_specs=[vmem, vmem, vmem, vmem, vmem,
                  pl.BlockSpec(memory_space=pl.ANY)],   # A stays in HBM; manual DMA
        out_specs=vmem,
        scratch_shapes=[
            pltpu.VMEM((N, N), jnp.bfloat16),           # A_hat landing buffer
            pltpu.SemaphoreType.DMA,
        ],
        compiler_params=pltpu.CompilerParams(
            vmem_limit_bytes=_vmem_limit_bytes(),
        ),
        cost_estimate=pl.CostEstimate(
            flops=flops, transcendentals=N * C, bytes_accessed=bytes_accessed),
    )(x_bf, w1t, b1.reshape(1, H).astype(jnp.float32),
      w2t, b2.reshape(1, C).astype(jnp.float32), a_bf)


def build_normalized_adjacency(edge_index, num_nodes):
    """Dense GCN-style normalization: D^{-1/2} (A + I) D^{-1/2} (plain-JAX glue).

    Self-loops get weight exactly 1 (matching add_remaining_self_loops), even if
    edge_index already contains them.  NOTE: the in-kernel propagation relies on
    A being symmetric (guaranteed by this builder).
    """
    src, dst = edge_index[0], edge_index[1]
    A = jnp.zeros((num_nodes, num_nodes), jnp.float32).at[dst, src].set(1.0)
    A = jnp.maximum(A, A.T)                                    # make undirected
    A = jnp.maximum(A, jnp.eye(num_nodes, dtype=jnp.float32))  # self-loops, weight 1
    deg = A.sum(axis=1)
    dinv = jnp.where(deg > 0, 1.0 / jnp.sqrt(deg), 0.0)
    return dinv[:, None] * A * dinv[None, :]


if __name__ == "__main__":
    # small synthetic config consistent with the module's __init__
    N = 128           # number of graph nodes (lane-aligned for the A buffer)
    F = 16            # args.num_features
    H = 32            # args.hidden
    C = 8             # args.num_classes
    K = 3             # args.K
    alpha = 0.1       # args.alpha

    key = jax.random.PRNGKey(0)
    k_x, k_w1, k_b1, k_w2, k_b2, k_e = jax.random.split(key, 6)

    x = jax.random.normal(k_x, (N, F), jnp.float32)

    # Deterministic synthetic parameters (PyTorch Linear shapes: W1 [H,F], W2 [C,H])
    W1 = jax.random.uniform(k_w1, (H, F), jnp.float32, -1.0, 1.0) / jnp.sqrt(F)
    b1 = jax.random.uniform(k_b1, (H,), jnp.float32, -1.0, 1.0) / jnp.sqrt(F)
    W2 = jax.random.uniform(k_w2, (C, H), jnp.float32, -1.0, 1.0) / jnp.sqrt(H)
    b2 = jax.random.uniform(k_b2, (C,), jnp.float32, -1.0, 1.0) / jnp.sqrt(H)

    # Synthetic edge_index [2, E]: ring graph + random edges
    ring_src = jnp.arange(N, dtype=jnp.int32)
    ring_dst = (ring_src + 1) % N
    rand_edges = jax.random.randint(k_e, (2, 2 * N), 0, N, jnp.int32)
    edge_index = jnp.concatenate(
        [jnp.stack([ring_src, ring_dst]), rand_edges], axis=1)

    A_hat = build_normalized_adjacency(edge_index, N)

    out = appnp_forward(x, W1, b1, W2, b2, A_hat, K=K, alpha=alpha)
    jax.block_until_ready(out)

    # Pure-JAX reference mirroring the kernel's bf16-operand / f32-accumulate policy.
    def ref_forward():
        xb = x.astype(jnp.bfloat16)
        h = jnp.maximum(jnp.dot(xb, W1.T.astype(jnp.bfloat16),
                                preferred_element_type=jnp.float32) + b1, 0.0)
        z0 = jnp.dot(h.astype(jnp.bfloat16), W2.T.astype(jnp.bfloat16),
                     preferred_element_type=jnp.float32) + b2
        ab = A_hat.astype(jnp.bfloat16)
        z = z0
        for _ in range(K):
            z = (1.0 - alpha) * jnp.dot(ab, z.astype(jnp.bfloat16),
                                        preferred_element_type=jnp.float32) + alpha * z0
        return jax.nn.log_softmax(z, axis=1)

    ref = ref_forward()

    # sanity: log_softmax rows must sum to ~1 in prob space, and match the ref
    assert out.shape == (N, C)
    row_sums = jnp.exp(out).sum(axis=1)
    assert bool(jnp.all(jnp.abs(row_sums - 1.0) < 1e-4))
    assert bool(jnp.max(jnp.abs(out - ref)) < 5e-2)
    print("KERNEL_OK")
</pallas_src>

<mosaic_0001>
module attributes {stable_mosaic.version = 11 : i64} {
  func.func @appnp_kernel(%arg0: memref<128x16xbf16, #tpu.memory_space<vmem>>, %arg1: memref<16x32xbf16, #tpu.memory_space<vmem>>, %arg2: memref<1x32xf32, #tpu.memory_space<vmem>>, %arg3: memref<32x8xbf16, #tpu.memory_space<vmem>>, %arg4: memref<1x8xf32, #tpu.memory_space<vmem>>, %arg5: memref<128x128xbf16, #tpu.memory_space<any>>, %arg6: memref<128x8xf32, #tpu.memory_space<vmem>>, %arg7: memref<128x128xbf16, #tpu.memory_space<vmem>>, %arg8: memref<!tpu.dma_semaphore, #tpu.memory_space<semaphore_mem>>) attributes {dimension_semantics = [], scalar_prefetch = 0 : i64, scratch_operands = 2 : i64, tpu.core_type = #tpu.core_type<tc>} {
    tpu.enqueue_dma source(%arg5 : memref<128x128xbf16, #tpu.memory_space<any>>) target(%arg7 : memref<128x128xbf16, #tpu.memory_space<vmem>>) target_semaphore(%arg8 : memref<!tpu.dma_semaphore, #tpu.memory_space<semaphore_mem>>)
    %c0 = arith.constant 0 : index
    %c0_0 = arith.constant 0 : index
    %0 = vector.load %arg0[%c0, %c0_0] : memref<128x16xbf16, #tpu.memory_space<vmem>>, vector<128x16xbf16>
    %c0_1 = arith.constant 0 : index
    %c0_2 = arith.constant 0 : index
    %1 = vector.load %arg1[%c0_1, %c0_2] : memref<16x32xbf16, #tpu.memory_space<vmem>>, vector<16x32xbf16>
    %cst = arith.constant dense<0.000000e+00> : vector<128x32xf32>
    %2 = tpu.matmul %0, %1, %cst {dimension_numbers = #tpu.dot_dimension_numbers<[1], [0], [0], [1], [0, 0, 1, 1], [], []>} : vector<128x16xbf16>, vector<16x32xbf16>, vector<128x32xf32> -> vector<128x32xf32>
    %c0_3 = arith.constant 0 : index
    %c0_4 = arith.constant 0 : index
    %3 = vector.load %arg2[%c0_3, %c0_4] : memref<1x32xf32, #tpu.memory_space<vmem>>, vector<1x32xf32>
    %4 = vector.broadcast %3 : vector<1x32xf32> to vector<128x32xf32>
    %5 = arith.addf %2, %4 : vector<128x32xf32>
    %cst_5 = arith.constant 0.000000e+00 : f32
    %6 = vector.broadcast %cst_5 : f32 to vector<128x32xf32>
    %7 = arith.maximumf %5, %6 : vector<128x32xf32>
    %8 = arith.truncf %7 : vector<128x32xf32> to vector<128x32xbf16>
    %c0_6 = arith.constant 0 : index
    %c0_7 = arith.constant 0 : index
    %9 = vector.load %arg3[%c0_6, %c0_7] : memref<32x8xbf16, #tpu.memory_space<vmem>>, vector<32x8xbf16>
    %cst_8 = arith.constant dense<0.000000e+00> : vector<128x8xf32>
    %10 = tpu.matmul %8, %9, %cst_8 {dimension_numbers = #tpu.dot_dimension_numbers<[1], [0], [0], [1], [0, 0, 1, 1], [], []>} : vector<128x32xbf16>, vector<32x8xbf16>, vector<128x8xf32> -> vector<128x8xf32>
    %c0_9 = arith.constant 0 : index
    %c0_10 = arith.constant 0 : index
    %11 = vector.load %arg4[%c0_9, %c0_10] : memref<1x8xf32, #tpu.memory_space<vmem>>, vector<1x8xf32>
    %12 = vector.broadcast %11 : vector<1x8xf32> to vector<128x8xf32>
    %13 = arith.addf %10, %12 : vector<128x8xf32>
    tpu.wait_dma2 semaphore(%arg8 : memref<!tpu.dma_semaphore, #tpu.memory_space<semaphore_mem>>) src(%arg5 : memref<128x128xbf16, #tpu.memory_space<any>>) dst(%arg7 : memref<128x128xbf16, #tpu.memory_space<vmem>>)
    %cst_11 = arith.constant 1.000000e-01 : f32
    %14 = vector.broadcast %cst_11 : f32 to vector<128x8xf32>
    %15 = arith.mulf %14, %13 : vector<128x8xf32>
    %c0_12 = arith.constant 0 : index
    %c0_13 = arith.constant 0 : index
    %16 = vector.load %arg7[%c0_12, %c0_13] : memref<128x128xbf16, #tpu.memory_space<vmem>>, vector<128x128xbf16>
    %17 = arith.truncf %13 : vector<128x8xf32> to vector<128x8xbf16>
    %cst_14 = arith.constant dense<0.000000e+00> : vector<128x8xf32>
    %18 = tpu.matmul %16, %17, %cst_14 {dimension_numbers = #tpu.dot_dimension_numbers<[1], [0], [0], [1], [0, 0, 1, 1], [], []>} : vector<128x128xbf16>, vector<128x8xbf16>, vector<128x8xf32> -> vector<128x8xf32>
    %cst_15 = arith.constant 0.899999976 : f32
    %19 = vector.broadcast %cst_15 : f32 to vector<128x8xf32>
    %20 = arith.mulf %18, %19 : vector<128x8xf32>
    %21 = arith.addf %20, %15 : vector<128x8xf32>
    %c0_16 = arith.constant 0 : index
    %c0_17 = arith.constant 0 : index
    %22 = vector.load %arg7[%c0_16, %c0_17] : memref<128x128xbf16, #tpu.memory_space<vmem>>, vector<128x128xbf16>
    %23 = arith.truncf %21 : vector<128x8xf32> to vector<128x8xbf16>
    %cst_18 = arith.constant dense<0.000000e+00> : vector<128x8xf32>
    %24 = tpu.matmul %22, %23, %cst_18 {dimension_numbers = #tpu.dot_dimension_numbers<[1], [0], [0], [1], [0, 0, 1, 1], [], []>} : vector<128x128xbf16>, vector<128x8xbf16>, vector<128x8xf32> -> vector<128x8xf32>
    %cst_19 = arith.constant 0.899999976 : f32
    %25 = vector.broadcast %cst_19 : f32 to vector<128x8xf32>
    %26 = arith.mulf %24, %25 : vector<128x8xf32>
    %27 = arith.addf %26, %15 : vector<128x8xf32>
    %c0_20 = arith.constant 0 : index
    %c0_21 = arith.constant 0 : index
    %28 = vector.load %arg7[%c0_20, %c0_21] : memref<128x128xbf16, #tpu.memory_space<vmem>>, vector<128x128xbf16>
    %29 = arith.truncf %27 : vector<128x8xf32> to vector<128x8xbf16>
    %cst_22 = arith.constant dense<0.000000e+00> : vector<128x8xf32>
    %30 = tpu.matmul %28, %29, %cst_22 {dimension_numbers = #tpu.dot_dimension_numbers<[1], [0], [0], [1], [0, 0, 1, 1], [], []>} : vector<128x128xbf16>, vector<128x8xbf16>, vector<128x8xf32> -> vector<128x8xf32>
    %cst_23 = arith.constant 0.899999976 : f32
    %31 = vector.broadcast %cst_23 : f32 to vector<128x8xf32>
    %32 = arith.mulf %30, %31 : vector<128x8xf32>
    %33 = arith.addf %32, %15 : vector<128x8xf32>
    %cst_24 = arith.constant dense<0xFF800000> : vector<128xf32>
    %34 = vector.multi_reduction <maximumf>, %33, %cst_24 [1] : vector<128x8xf32> to vector<128xf32>
    %35 = vector.shape_cast %34 : vector<128xf32> to vector<128x1xf32>
    %36 = vector.broadcast %35 : vector<128x1xf32> to vector<128x8xf32>
    %37 = arith.subf %33, %36 : vector<128x8xf32>
    %38 = math.exp %37 : vector<128x8xf32>
    %cst_25 = arith.constant dense<0.000000e+00> : vector<128xf32>
    %39 = vector.multi_reduction <add>, %38, %cst_25 [1] : vector<128x8xf32> to vector<128xf32>
    %40 = vector.shape_cast %39 : vector<128xf32> to vector<128x1xf32>
    %41 = math.log %40 : vector<128x1xf32>
    %42 = vector.broadcast %41 : vector<128x1xf32> to vector<128x8xf32>
    %43 = arith.subf %37, %42 : vector<128x8xf32>
    %c0_26 = arith.constant 0 : index
    %c0_27 = arith.constant 0 : index
    %44 = vector.load %arg6[%c0_26, %c0_27] : memref<128x8xf32, #tpu.memory_space<vmem>>, vector<128x8xf32>
    tpu.vector_store %arg6[%c0_26, %c0_27], %43 {strides = array<i32>} : memref<128x8xf32, #tpu.memory_space<vmem>>, vector<128x8xf32>,
    return
  }
}

</mosaic_0001>

<bundles_post_ra>
// kernel: tpu_custom_call.1
= control target key start
LH: loop header
LB: loop body
LE: loop exit
PB: predicated region body
PF: predicated region fallthrough
CT: control target
= control target key end

     0   :  { %s1955_s0 = inlined_call_operand.vmem [shape: bf16[128,16], index: 0, kind: input, shape index: {}]   ;;  %s1956_s1 = inlined_call_operand.vmem [shape: bf16[16,32], index: 1, kind: input, shape index: {}]   ;;  %s1957_s2 = inlined_call_operand.vmem [shape: f32[1,32], index: 2, kind: input, shape index: {}]   ;;  %s1958_s3 = inlined_call_operand.vmem [shape: bf16[32,8], index: 3, kind: input, shape index: {}]   ;;  %s1959_s4 = inlined_call_operand.vmem [shape: f32[1,8], index: 4, kind: input, shape index: {}]   ;;  %s1960_s5 = inlined_call_operand.vmem [shape: bf16[128,128], index: 5, kind: input, shape index: {}]   ;;  %s1961_s6 = inlined_call_operand.vmem [shape: f32[128,8], index: 6, kind: output, shape index: {}]  }
   0x1   :  { %v1468_v0 = vld [vmem:[%s1960_s5] sm:$0xff]  ;;  %v1473_v1 = vld [vmem:[%s1960_s5 + $0x8] sm:$0xff]  ;;  %v1478_v2 = vld [vmem:[%s1960_s5 + $0x10] sm:$0xff] }
   0x2   :  { %v1483_v3 = vld [vmem:[%s1960_s5 + $0x18] sm:$0xff]  ;;  %v1488_v4 = vld [vmem:[%s1960_s5 + $0x20] sm:$0xff]  ;;  %v1493_v5 = vld [vmem:[%s1960_s5 + $0x28] sm:$0xff] }
   0x3   :  { %v1498_v6 = vld [vmem:[%s1960_s5 + $0x30] sm:$0xff]  ;;  %v1503_v7 = vld [vmem:[%s1960_s5 + $0x38] sm:$0xff] }
   0x4   :  { %77 = vsyncadd [#allocation3], 1024  ;;  %v1353_v8 = vld [vmem:[%s1956_s1] sm:$0xff]   ;;  %vm149_vm0 = vcmask 130048   ;;  %v1355_v10 = vld [vmem:[%s1955_s0 + $0x8] sm:$0xff]   ;;  %vm318_vm1 = vcmask 261120  }
   0x5   :  { %v1354_v9 = vld [vmem:[%s1955_s0] sm:$0xff]   ;;  %1203 = vmatprep.subr.bf16.mxu0 %v1353_v8  ;;  %v1356_v11 = vld [vmem:[%s1955_s0 + $0x10] sm:$0xff]   ;;  %v1357_v12 = vld [vmem:[%s1955_s0 + $0x18] sm:$0xff]  }
   0x6   :  { %1204 = vmatpush3.bf16.msra.mxu0 %v1353_v8  ;;  %1205 = vmatprep.mubr.msk.bf16.mxu0 %vm149_vm0, %v1354_v9  ;;  %v1358_v13 = vld [vmem:[%s1955_s0 + $0x20] sm:$0xff]   ;;  %v1359_v14 = vld [vmem:[%s1955_s0 + $0x28] sm:$0xff]   ;;  %v1360_v15 = vld [vmem:[%s1955_s0 + $0x30] sm:$0xff]  }
   0x7   :  { %v1361_v16 = vld [vmem:[%s1955_s0 + $0x38] sm:$0xff]   ;;  %v1362_v17 = vld [vmem:[%s1958_s3] sm:$0xff]   ;;  %v1363_v18 = vld [vmem:[%s1958_s3 + $0x8] sm:$0xff]  }
   0x8   :  { %1221 = vmatprep.subr.bf16.mxu1 %v1362_v17  ;;  %v1106_v19 = vld [vmem:[%s1957_s2] ss:$0 sm:$0xff] }
   0x9   :  { %1206 = vmatmul.mubr.msk.bf16.vlgmr.msra.gmra.mrb[0].mxu0 %vm149_vm0, %v1355_v10  ;;  %1222 = vmatpush3.bf16.msra.mxu1 %v1362_v17 }
   0xa   :  { %1209 = vmatprep.mubr.msk.bf16.mxu0 %vm149_vm0, %v1356_v11  ;;  %1223 = vmatprep.subr.bf16.mxu1 %v1363_v18 }
   0xd   :  { %1224 = vmatpush3.bf16.msra.mxu1 %v1363_v18 }
  0x11   :  { %1210 = vmatmul.mubr.msk.bf16.gmra.mrb[4].mxu0 %vm149_vm0, %v1357_v12 }
  0x12   :  { %1213 = vmatprep.mubr.msk.bf16.mxu0 %vm149_vm0, %v1358_v13 }
  0x19   :  { %1214 = vmatmul.mubr.msk.bf16.gmra.mrb[8].mxu0 %vm149_vm0, %v1359_v14 }
  0x1a   :  { %1217 = vmatprep.mubr.msk.bf16.mxu0 %vm149_vm0, %v1360_v15 }
  0x21   :  { %1218 = vmatmul.mubr.msk.bf16.gmra.mrb[12].mxu0 %vm149_vm0, %v1361_v16 }
  0x22   :  { %1257 = vmatprep.mubr.bf16.mxu0 %v1468_v0 }
  0xdc   :  { %v1207_v20 = vpop.f32.mrb[0].mxu0 }
  0xdd   :  { %v217_v21 = vadd.f32 %v1207_v20, %v1106_v19  ;;  %v208_v22 = vpop.f32.mrb[1].mxu0 }
  0xde   :  { %v209_v23 = vadd.f32 %v1106_v19, %v208_v22  ;;  %v1208_v24 = vpop.f32.mrb[2].mxu0 }
  0xdf   :  { %v220_v25 = vadd.f32 %v1208_v24, %v1106_v19  ;;  %v211_v26 = vpop.f32.mrb[3].mxu0  ;;  %v273_v28 = vmax.f32 %v217_v21, 0.0  ;;  %v1124_v21 = vld [vmem:[%s1959_s4] ss:$0 sm:$0xff] }
  0xe0   :  { %v212_v27 = vadd.f32 %v1106_v19, %v211_v26  ;;  %v271_v30 = vmax.f32 %v209_v23, 0.0 }
  0xe1   :  { %v274_v29 = vmax.f32 %v220_v25, 0.0 }
  0xe2   :  { %v272_v31 = vmax.f32 %v212_v27, 0.0 }
  0xe3   :  { %v288_v32 = vpack.c.bf16 %v274_v29, %v273_v28 }
  0xe4   :  { %v1211_v33 = vpop.f32.mrb[4].mxu0  ;;  %v287_v34 = vpack.c.bf16 %v272_v31, %v271_v30 }
  0xe5   :  { %v233_v35 = vadd.f32 %v1211_v33, %v1106_v19  ;;  %v224_v36 = vpop.f32.mrb[5].mxu0 }
  0xe6   :  { %v225_v37 = vadd.f32 %v1106_v19, %v224_v36  ;;  %v1212_v38 = vpop.f32.mrb[6].mxu0  ;;  %1225 = vmatprep.mubr.msk.bf16.mxu1 %vm318_vm1, %v287_v34 }
  0xe7   :  { %v236_v39 = vadd.f32 %v1212_v38, %v1106_v19  ;;  %v227_v40 = vpop.f32.mrb[7].mxu0  ;;  %1226 = vmatmul.mubr.msk.bf16.vlgmr.msra.gmra.mrb[0].mxu1 %vm318_vm1, %v288_v32  ;;  %v277_v42 = vmax.f32 %v233_v35, 0.0 }
  0xe8   :  { %v228_v41 = vadd.f32 %v1106_v19, %v227_v40  ;;  %v275_v44 = vmax.f32 %v225_v37, 0.0 }
  0xe9   :  { %v278_v43 = vmax.f32 %v236_v39, 0.0 }
  0xea   :  { %v276_v45 = vmax.f32 %v228_v41, 0.0 }
  0xeb   :  { %v290_v46 = vpack.c.bf16 %v278_v43, %v277_v42 }
  0xec   :  { %v289_v47 = vpack.c.bf16 %v276_v45, %v275_v44  ;;  %v1215_v48 = vpop.f32.mrb[8].mxu0 }
  0xed   :  { %v249_v49 = vadd.f32 %v1215_v48, %v1106_v19  ;;  %v240_v50 = vpop.f32.mrb[9].mxu0 }
  0xee   :  { %v241_v51 = vadd.f32 %v1106_v19, %v240_v50  ;;  %v1216_v52 = vpop.f32.mrb[10].mxu0  ;;  %1229 = vmatprep.mubr.msk.bf16.mxu1 %vm318_vm1, %v289_v47 }
  0xef   :  { %v252_v53 = vadd.f32 %v1216_v52, %v1106_v19  ;;  %v243_v54 = vpop.f32.mrb[11].mxu0  ;;  %1230 = vmatmul.mubr.msk.bf16.gmra.mrb[4].mxu1 %vm318_vm1, %v290_v46  ;;  %v281_v56 = vmax.f32 %v249_v49, 0.0 }
  0xf0   :  { %v244_v55 = vadd.f32 %v1106_v19, %v243_v54  ;;  %v279_v58 = vmax.f32 %v241_v51, 0.0 }
  0xf1   :  { %v282_v57 = vmax.f32 %v252_v53, 0.0 }
  0xf2   :  { %v280_v59 = vmax.f32 %v244_v55, 0.0 }
  0xf3   :  { %v292_v60 = vpack.c.bf16 %v282_v57, %v281_v56 }
  0xf4   :  { %v291_v61 = vpack.c.bf16 %v280_v59, %v279_v58  ;;  %v1219_v62 = vpop.f32.mrb[12].mxu0 }
  0xf5   :  { %v265_v63 = vadd.f32 %v1219_v62, %v1106_v19  ;;  %v256_v8 = vpop.f32.mrb[13].mxu0 }
  0xf6   :  { %v257_v9 = vadd.f32 %v1106_v19, %v256_v8  ;;  %v1220_v10 = vpop.f32.mrb[14].mxu0  ;;  %1233 = vmatprep.mubr.msk.bf16.mxu1 %vm318_vm1, %v291_v61 }
  0xf7   :  { %v268_v11 = vadd.f32 %v1220_v10, %v1106_v19  ;;  %v259_v12 = vpop.f32.mrb[15].mxu0  ;;  %1234 = vmatmul.mubr.msk.bf16.gmra.mrb[8].mxu1 %vm318_vm1, %v292_v60  ;;  %v285_v14 = vmax.f32 %v265_v63, 0.0 }
  0xf8   :  { %v260_v13 = vadd.f32 %v1106_v19, %v259_v12  ;;  %v283_v16 = vmax.f32 %v257_v9, 0.0 }
  0xf9   :  { %v286_v15 = vmax.f32 %v268_v11, 0.0 }
  0xfa   :  { %v284_v17 = vmax.f32 %v260_v13, 0.0 }
  0xfb   :  { %v294_v18 = vpack.c.bf16 %v286_v15, %v285_v14 }
  0xfc   :  { %v293_v20 = vpack.c.bf16 %v284_v17, %v283_v16 }
  0xfe   :  { %1237 = vmatprep.mubr.msk.bf16.mxu1 %vm318_vm1, %v293_v20 }
  0xff   :  { %1238 = vmatmul.mubr.msk.bf16.gmra.mrb[12].mxu1 %vm318_vm1, %v294_v18 }
 0x1ba   :  { %v1227_v22 = vpop.f32.mrb[0].mxu1 }
 0x1bb   :  { %v1560_v23 = vadd.f32 %v1227_v22, %v1124_v21  ;;  %v377_v24 = vpop.f32.mrb[1].mxu1 }
 0x1bc   :  { %v1562_v25 = vadd.f32 %v1124_v21, %v377_v24  ;;  %v1228_v19 = vpop.f32.mrb[2].mxu1 }
 0x1bd   :  { %v1564_v26 = vadd.f32 %v1228_v19, %v1124_v21  ;;  %v380_v27 = vpop.f32.mrb[3].mxu1 }
 0x1be   :  { %v1566_v28 = vadd.f32 %v1124_v21, %v380_v27 }
 0x1bf   :  { %v469_v54 = vpack.c.bf16 %v1564_v26, %v1560_v23 }
 0x1c0   :  { %v468_v53 = vpack.c.bf16 %v1566_v28, %v1562_v25 }
 0x1c2   :  { %v1231_v29 = vpop.f32.mrb[4].mxu1 }
 0x1c3   :  { %v1568_v30 = vadd.f32 %v1231_v29, %v1124_v21  ;;  %v393_v31 = vpop.f32.mrb[5].mxu1 }
 0x1c4   :  { %v1570_v32 = vadd.f32 %v1124_v21, %v393_v31  ;;  %v1232_v33 = vpop.f32.mrb[6].mxu1 }
 0x1c5   :  { %v1572_v34 = vadd.f32 %v1232_v33, %v1124_v21  ;;  %v396_v35 = vpop.f32.mrb[7].mxu1 }
 0x1c6   :  { %v1574_v36 = vadd.f32 %v1124_v21, %v396_v35 }
 0x1ca   :  { %v1235_v37 = vpop.f32.mrb[8].mxu1 }
 0x1cb   :  { %v1576_v38 = vadd.f32 %v1235_v37, %v1124_v21  ;;  %v409_v39 = vpop.f32.mrb[9].mxu1 }
 0x1cc   :  { %v1578_v40 = vadd.f32 %v1124_v21, %v409_v39  ;;  %v1236_v41 = vpop.f32.mrb[10].mxu1 }
 0x1cd   :  { %v1580_v42 = vadd.f32 %v1236_v41, %v1124_v21  ;;  %v412_v43 = vpop.f32.mrb[11].mxu1 }
 0x1ce   :  { %v1582_v44 = vadd.f32 %v1124_v21, %v412_v43 }
 0x1d2   :  { %v1239_v45 = vpop.f32.mrb[12].mxu1 }
 0x1d3   :  { %v1584_v46 = vadd.f32 %v1239_v45, %v1124_v21  ;;  %v425_v47 = vpop.f32.mrb[13].mxu1 }
 0x1d4   :  { %v1586_v48 = vadd.f32 %v1124_v21, %v425_v47  ;;  %v1240_v49 = vpop.f32.mrb[14].mxu1 }
 0x1d5   :  { %v1588_v50 = vadd.f32 %v1240_v49, %v1124_v21  ;;  %v428_v51 = vpop.f32.mrb[15].mxu1 }
 0x1d6   :  { %v1590_v52 = vadd.f32 %v1124_v21, %v428_v51 }
 0x1d7   :  { %1428 = dma.done.wait [#allocation3], 1024 }
 0x1d8   :  { %1429 = vsyncadd [#allocation3], 4294966272  ;;  %1289 = vmatprep.mubr.bf16.mxu1 %v1468_v0  ;;  %1241 = vmatprep.subr.bf16.mxu0 %v468_v53  ;;  %v470_v55 = vpack.c.bf16 %v1574_v36, %v1570_v32  ;;  %v471_v56 = vpack.c.bf16 %v1572_v34, %v1568_v30  ;;  %v472_v57 = vpack.c.bf16 %v1582_v44, %v1578_v40  ;;  %v1619_v61 = vmul.f32 0.1, %v1560_v23 }
 0x1d9   :  { %1242 = vmatpush3.bf16.msra.mxu0 %v468_v53  ;;  %v473_v58 = vpack.c.bf16 %v1580_v42, %v1576_v38  ;;  %v474_v59 = vpack.c.bf16 %v1590_v52, %v1586_v48  ;;  %v475_v60 = vpack.c.bf16 %v1588_v50, %v1584_v46  ;;  %v1622_v63 = vmul.f32 0.1, %v1562_v25 }
 0x1da   :  { %1243 = vmatprep.subr.bf16.mxu0 %v469_v54  ;;  %v1625_v10 = vmul.f32 0.1, %v1564_v26  ;;  %v1628_v13 = vmul.f32 0.1, %v1566_v28  ;;  %v1635_v22 = vmul.f32 0.1, %v1568_v30 }
 0x1db   :  { %v1638_v24 = vmul.f32 0.1, %v1570_v32  ;;  %v1641_v27 = vmul.f32 0.1, %v1572_v34  ;;  %v1644_v31 = vmul.f32 0.1, %v1574_v36 }
 0x1dc   :  { %v1651_v43 = vmul.f32 0.1, %v1576_v38  ;;  %v1654_v45 = vmul.f32 0.1, %v1578_v40  ;;  %v1657_v53 = vmul.f32 0.1, %v1580_v42 }
 0x1dd   :  { %1244 = vmatpush3.bf16.msra.mxu0 %v469_v54  ;;  %vm879_vm2 = vcmask 64512  }
 0x1de   :  { %1245 = vmatprep.subr.bf16.mxu0 %v470_v55 }
 0x1e1   :  { %1246 = vmatpush3.bf16.msra.mxu0 %v470_v55 }
 0x1e2   :  { %1247 = vmatprep.subr.bf16.mxu0 %v471_v56 }
 0x1e5   :  { %1248 = vmatpush3.bf16.msra.mxu0 %v471_v56  ;;  %v1660_v56 = vmul.f32 0.1, %v1582_v44 }
 0x1e6   :  { %1249 = vmatprep.subr.bf16.mxu0 %v472_v57 }
 0x1e9   :  { %1250 = vmatpush3.bf16.msra.mxu0 %v472_v57 }
 0x1ea   :  { %1251 = vmatprep.subr.bf16.mxu0 %v473_v58 }
 0x1ed   :  { %1252 = vmatpush3.bf16.msra.mxu0 %v473_v58 }
 0x1ee   :  { %1253 = vmatprep.subr.bf16.mxu0 %v474_v59 }
 0x1f1   :  { %1254 = vmatpush3.bf16.msra.mxu0 %v474_v59 }
 0x1f2   :  { %1255 = vmatprep.subr.bf16.mxu0 %v475_v60 }
 0x1f5   :  { %1256 = vmatpush3.bf16.msra.mxu0 %v475_v60 }
 0x1f8   :  { %1258 = vmatmul.mubr.bf16.vlgmr.msra.gmra.mrb[16].mxu0 %v1473_v1 }
 0x1f9   :  { %1261 = vmatprep.mubr.bf16.mxu0 %v1478_v2 }
 0x200   :  { %1262 = vmatmul.mubr.bf16.gmra.mrb[20].mxu0 %v1483_v3 }
 0x201   :  { %1265 = vmatprep.mubr.bf16.mxu0 %v1488_v4 }
 0x208   :  { %1266 = vmatmul.mubr.bf16.gmra.mrb[24].mxu0 %v1493_v5 }
 0x209   :  { %1269 = vmatprep.mubr.bf16.mxu0 %v1498_v6 }
 0x210   :  { %1270 = vmatmul.mubr.bf16.gmra.mrb[28].mxu0 %v1503_v7 }
 0x211   :  { %1321 = vmatprep.mubr.bf16.mxu0 %v1468_v0 }
 0x2cb   :  { %v1259_v62 = vpop.f32.mrb[16].mxu0 }
 0x2cc   :  { %v575_v8 = vmul.f32 0.9, %v1259_v62  ;;  %v510_v9 = vpop.f32.mrb[17].mxu0 }
 0x2cd   :  { %v573_v11 = vmul.f32 0.9, %v510_v9  ;;  %v1260_v12 = vpop.f32.mrb[18].mxu0  ;;  %v1670_v9 = vmul.f32 0.1, %v1586_v48 }
 0x2ce   :  { %v576_v14 = vmul.f32 0.9, %v1260_v12  ;;  %v513_v15 = vpop.f32.mrb[19].mxu0  ;;  %v591_v16 = vadd.f32 %v575_v8, %v1619_v61  ;;  %v1667_v8 = vmul.f32 0.1, %v1584_v46 }
 0x2cf   :  { %v574_v0 = vmul.f32 0.9, %v513_v15  ;;  %v589_v18 = vadd.f32 %v573_v11, %v1622_v63  ;;  %v1673_v15 = vmul.f32 0.1, %v1588_v50 }
 0x2d0   :  { %v592_v17 = vadd.f32 %v576_v14, %v1625_v10 }
 0x2d1   :  { %v590_v20 = vadd.f32 %v574_v0, %v1628_v13 }
 0x2d2   :  { %v606_v21 = vpack.c.bf16 %v592_v17, %v591_v16  ;;  %v1676_v17 = vmul.f32 0.1, %v1590_v52 }
 0x2d3   :  { %v1263_v23 = vpop.f32.mrb[20].mxu0  ;;  %v605_v25 = vpack.c.bf16 %v590_v20, %v589_v18 }
 0x2d4   :  { %v579_v19 = vmul.f32 0.9, %v1263_v23  ;;  %v526_v26 = vpop.f32.mrb[21].mxu0 }
 0x2d5   :  { %v577_v28 = vmul.f32 0.9, %v526_v26  ;;  %v1264_v29 = vpop.f32.mrb[22].mxu0  ;;  %1273 = vmatprep.subr.bf16.mxu1 %v605_v25 }
 0x2d6   :  { %v580_v33 = vmul.f32 0.9, %v1264_v29  ;;  %v529_v35 = vpop.f32.mrb[23].mxu0  ;;  %1274 = vmatpush3.bf16.msra.mxu1 %v605_v25  ;;  %v595_v32 = vadd.f32 %v579_v19, %v1635_v22 }
 0x2d7   :  { %v578_v30 = vmul.f32 0.9, %v529_v35  ;;  %1275 = vmatprep.subr.bf16.mxu1 %v606_v21  ;;  %v593_v39 = vadd.f32 %v577_v28, %v1638_v24 }
 0x2d8   :  { %v596_v37 = vadd.f32 %v580_v33, %v1641_v27 }
 0x2d9   :  { %v594_v34 = vadd.f32 %v578_v30, %v1644_v31 }
 0x2da   :  { %1276 = vmatpush3.bf16.msra.mxu1 %v606_v21  ;;  %v608_v41 = vpack.c.bf16 %v596_v37, %v595_v32 }
 0x2db   :  { %v1267_v36 = vpop.f32.mrb[24].mxu0  ;;  %v607_v47 = vpack.c.bf16 %v594_v34, %v593_v39 }
 0x2dc   :  { %v583_v49 = vmul.f32 0.9, %v1267_v36  ;;  %v542_v51 = vpop.f32.mrb[25].mxu0 }
 0x2dd   :  { %v581_v54 = vmul.f32 0.9, %v542_v51  ;;  %v1268_v55 = vpop.f32.mrb[26].mxu0  ;;  %1277 = vmatprep.subr.bf16.mxu1 %v607_v47 }
 0x2de   :  { %v584_v57 = vmul.f32 0.9, %v1268_v55  ;;  %v545_v58 = vpop.f32.mrb[27].mxu0  ;;  %1278 = vmatpush3.bf16.msra.mxu1 %v607_v47  ;;  %v599_v40 = vadd.f32 %v583_v49, %v1651_v43 }
 0x2df   :  { %v582_v38 = vmul.f32 0.9, %v545_v58  ;;  %1279 = vmatprep.subr.bf16.mxu1 %v608_v41  ;;  %v597_v60 = vadd.f32 %v581_v54, %v1654_v45 }
 0x2e0   :  { %v600_v59 = vadd.f32 %v584_v57, %v1657_v53 }
 0x2e1   :  { %v598_v42 = vadd.f32 %v582_v38, %v1660_v56 }
 0x2e2   :  { %1280 = vmatpush3.bf16.msra.mxu1 %v608_v41  ;;  %v610_v62 = vpack.c.bf16 %v600_v59, %v599_v40 }
 0x2e3   :  { %v1271_v44 = vpop.f32.mrb[28].mxu0  ;;  %v609_v11 = vpack.c.bf16 %v598_v42, %v597_v60 }
 0x2e4   :  { %v587_v12 = vmul.f32 0.9, %v1271_v44  ;;  %v558_v14 = vpop.f32.mrb[29].mxu0 }
 0x2e5   :  { %v585_v0 = vmul.f32 0.9, %v558_v14  ;;  %v1272_v16 = vpop.f32.mrb[30].mxu0  ;;  %1281 = vmatprep.subr.bf16.mxu1 %v609_v11 }
 0x2e6   :  { %v588_v18 = vmul.f32 0.9, %v1272_v16  ;;  %v561_v20 = vpop.f32.mrb[31].mxu0  ;;  %1282 = vmatpush3.bf16.msra.mxu1 %v609_v11  ;;  %v603_v48 = vadd.f32 %v587_v12, %v1667_v8 }
 0x2e7   :  { %v586_v46 = vmul.f32 0.9, %v561_v20  ;;  %1283 = vmatprep.subr.bf16.mxu1 %v610_v62  ;;  %v601_v23 = vadd.f32 %v585_v0, %v1670_v9 }
 0x2e8   :  { %v604_v21 = vadd.f32 %v588_v18, %v1673_v15 }
 0x2e9   :  { %v602_v50 = vadd.f32 %v586_v46, %v1676_v17 }
 0x2ea   :  { %1284 = vmatpush3.bf16.msra.mxu1 %v610_v62  ;;  %v612_v25 = vpack.c.bf16 %v604_v21, %v603_v48 }
 0x2eb   :  { %v611_v19 = vpack.c.bf16 %v602_v50, %v601_v23 }
 0x2ed   :  { %1285 = vmatprep.subr.bf16.mxu1 %v611_v19 }
 0x2ee   :  { %1286 = vmatpush3.bf16.msra.mxu1 %v611_v19 }
 0x2ef   :  { %1287 = vmatprep.subr.bf16.mxu1 %v612_v25 }
 0x2f2   :  { %1288 = vmatpush3.bf16.msra.mxu1 %v612_v25 }
 0x2f5   :  { %1290 = vmatmul.mubr.bf16.vlgmr.msra.gmra.mrb[16].mxu1 %v1473_v1 }
 0x2f6   :  { %1293 = vmatprep.mubr.bf16.mxu1 %v1478_v2 }
 0x2fd   :  { %1294 = vmatmul.mubr.bf16.gmra.mrb[20].mxu1 %v1483_v3 }
 0x2fe   :  { %1297 = vmatprep.mubr.bf16.mxu1 %v1488_v4 }
 0x305   :  { %1298 = vmatmul.mubr.bf16.gmra.mrb[24].mxu1 %v1493_v5 }
 0x306   :  { %1301 = vmatprep.mubr.bf16.mxu1 %v1498_v6 }
 0x30d   :  { %1302 = vmatmul.mubr.bf16.gmra.mrb[28].mxu1 %v1503_v7 }
 0x30e   :  { %1333 = vmatprep.mubr.bf16.mxu1 %v1498_v6 }
 0x3c8   :  { %v1291_v52 = vpop.f32.mrb[16].mxu1 }
 0x3c9   :  { %v712_v26 = vmul.f32 0.9, %v1291_v52  ;;  %v647_v28 = vpop.f32.mrb[17].mxu1 }
 0x3ca   :  { %v710_v29 = vmul.f32 0.9, %v647_v28  ;;  %v1292_v33 = vpop.f32.mrb[18].mxu1 }
 0x3cb   :  { %v713_v35 = vmul.f32 0.9, %v1292_v33  ;;  %v650_v30 = vpop.f32.mrb[19].mxu1  ;;  %v728_v37 = vadd.f32 %v712_v26, %v1619_v61 }
 0x3cc   :  { %v711_v32 = vmul.f32 0.9, %v650_v30  ;;  %v726_v34 = vadd.f32 %v710_v29, %v1622_v63 }
 0x3cd   :  { %v729_v39 = vadd.f32 %v713_v35, %v1625_v10 }
 0x3ce   :  { %v727_v41 = vadd.f32 %v711_v32, %v1628_v13 }
 0x3cf   :  { %v743_v36 = vpack.c.bf16 %v729_v39, %v728_v37 }
 0x3d0   :  { %v742_v47 = vpack.c.bf16 %v727_v41, %v726_v34  ;;  %v1295_v49 = vpop.f32.mrb[20].mxu1 }
 0x3d1   :  { %v716_v6 = vmul.f32 0.9, %v1295_v49  ;;  %v663_v51 = vpop.f32.mrb[21].mxu1 }
 0x3d2   :  { %v714_v54 = vmul.f32 0.9, %v663_v51  ;;  %v1296_v55 = vpop.f32.mrb[22].mxu1  ;;  %1305 = vmatprep.subr.bf16.mxu0 %v742_v47  ;;  %1337 = vmatprep.subr.bf16.mxu1 %v742_v47 }
 0x3d3   :  { %v717_v57 = vmul.f32 0.9, %v1296_v55  ;;  %v666_v58 = vpop.f32.mrb[23].mxu1  ;;  %1306 = vmatpush3.bf16.msra.mxu0 %v742_v47  ;;  %1345 = vmatpush3.bf16.msra.mxu1 %v742_v47  ;;  %v732_v40 = vadd.f32 %v716_v6, %v1635_v22 }
 0x3d4   :  { %v715_v38 = vmul.f32 0.9, %v666_v58  ;;  %1307 = vmatprep.subr.bf16.mxu0 %v743_v36  ;;  %1338 = vmatprep.subr.bf16.mxu1 %v743_v36  ;;  %v730_v60 = vadd.f32 %v714_v54, %v1638_v24 }
 0x3d5   :  { %v733_v59 = vadd.f32 %v717_v57, %v1641_v27 }
 0x3d6   :  { %v731_v42 = vadd.f32 %v715_v38, %v1644_v31 }
 0x3d7   :  { %v745_v62 = vpack.c.bf16 %v733_v59, %v732_v40  ;;  %1308 = vmatpush3.bf16.msra.mxu0 %v743_v36  ;;  %1346 = vmatpush3.bf16.msra.mxu1 %v743_v36 }
 0x3d8   :  { %v744_v44 = vpack.c.bf16 %v731_v42, %v730_v60  ;;  %v1299_v11 = vpop.f32.mrb[24].mxu1 }
 0x3d9   :  { %v720_v12 = vmul.f32 0.9, %v1299_v11  ;;  %v679_v14 = vpop.f32.mrb[25].mxu1 }
 0x3da   :  { %v718_v0 = vmul.f32 0.9, %v679_v14  ;;  %v1300_v16 = vpop.f32.mrb[26].mxu1  ;;  %1309 = vmatprep.subr.bf16.mxu0 %v744_v44  ;;  %1339 = vmatprep.subr.bf16.mxu1 %v744_v44 }
 0x3db   :  { %v721_v18 = vmul.f32 0.9, %v1300_v16  ;;  %v682_v20 = vpop.f32.mrb[27].mxu1  ;;  %1310 = vmatpush3.bf16.msra.mxu0 %v744_v44  ;;  %1347 = vmatpush3.bf16.msra.mxu1 %v744_v44  ;;  %v736_v48 = vadd.f32 %v720_v12, %v1651_v43 }
 0x3dc   :  { %v719_v46 = vmul.f32 0.9, %v682_v20  ;;  %1311 = vmatprep.subr.bf16.mxu0 %v745_v62  ;;  %1340 = vmatprep.subr.bf16.mxu1 %v745_v62  ;;  %v734_v23 = vadd.f32 %v718_v0, %v1654_v45 }
 0x3dd   :  { %v737_v21 = vadd.f32 %v721_v18, %v1657_v53 }
 0x3de   :  { %v735_v50 = vadd.f32 %v719_v46, %v1660_v56 }
 0x3df   :  { %v747_v25 = vpack.c.bf16 %v737_v21, %v736_v48  ;;  %1312 = vmatpush3.bf16.msra.mxu0 %v745_v62  ;;  %1348 = vmatpush3.bf16.msra.mxu1 %v745_v62 }
 0x3e0   :  { %v746_v19 = vpack.c.bf16 %v735_v50, %v734_v23  ;;  %v1303_v52 = vpop.f32.mrb[28].mxu1 }
 0x3e1   :  { %v724_v26 = vmul.f32 0.9, %v1303_v52  ;;  %v695_v28 = vpop.f32.mrb[29].mxu1 }
 0x3e2   :  { %v722_v29 = vmul.f32 0.9, %v695_v28  ;;  %v1304_v33 = vpop.f32.mrb[30].mxu1  ;;  %1313 = vmatprep.subr.bf16.mxu0 %v746_v19  ;;  %1341 = vmatprep.subr.bf16.mxu1 %v746_v19 }
 0x3e3   :  { %v725_v35 = vmul.f32 0.9, %v1304_v33  ;;  %v698_v30 = vpop.f32.mrb[31].mxu1  ;;  %1314 = vmatpush3.bf16.msra.mxu0 %v746_v19  ;;  %1349 = vmatpush3.bf16.msra.mxu1 %v746_v19  ;;  %v740_v37 = vadd.f32 %v724_v26, %v1667_v8 }
 0x3e4   :  { %v723_v32 = vmul.f32 0.9, %v698_v30  ;;  %1315 = vmatprep.subr.bf16.mxu0 %v747_v25  ;;  %1342 = vmatprep.subr.bf16.mxu1 %v747_v25  ;;  %v738_v34 = vadd.f32 %v722_v29, %v1670_v9 }
 0x3e5   :  { %v741_v39 = vadd.f32 %v725_v35, %v1673_v15 }
 0x3e6   :  { %v739_v41 = vadd.f32 %v723_v32, %v1676_v17 }
 0x3e7   :  { %v749_v36 = vpack.c.bf16 %v741_v39, %v740_v37  ;;  %1316 = vmatpush3.bf16.msra.mxu0 %v747_v25  ;;  %1350 = vmatpush3.bf16.msra.mxu1 %v747_v25 }
 0x3e8   :  { %v748_v47 = vpack.c.bf16 %v739_v41, %v738_v34 }
 0x3ea   :  { %1317 = vmatprep.subr.bf16.mxu0 %v748_v47  ;;  %1343 = vmatprep.subr.bf16.mxu1 %v748_v47 }
 0x3eb   :  { %1318 = vmatpush3.bf16.msra.mxu0 %v748_v47  ;;  %1351 = vmatpush3.bf16.msra.mxu1 %v748_v47 }
 0x3ec   :  { %1319 = vmatprep.subr.bf16.mxu0 %v749_v36  ;;  %1344 = vmatprep.subr.bf16.mxu1 %v749_v36 }
 0x3ef   :  { %1320 = vmatpush3.bf16.msra.mxu0 %v749_v36  ;;  %1352 = vmatpush3.bf16.msra.mxu1 %v749_v36 }
 0x3f2   :  { %1322 = vmatmul.mubr.bf16.vlgmr.msra.gmra.mrb[32].mxu0 %v1473_v1  ;;  %1334 = vmatmul.mubr.bf16.vlgmr.msra.gmra.mrb[32].mxu1 %v1503_v7 }
 0x3f3   :  { %1325 = vmatprep.mubr.bf16.mxu0 %v1478_v2 }
 0x3fa   :  { %1326 = vmatmul.mubr.bf16.gmra.mrb[36].mxu0 %v1483_v3 }
 0x3fb   :  { %1329 = vmatprep.mubr.bf16.mxu0 %v1488_v4 }
 0x402   :  { %1330 = vmatmul.mubr.bf16.gmra.mrb[40].mxu0 %v1493_v5 }
 0x4c5   :  { %v1323_v49 = vpop.f32.mrb[32].mxu0  ;;  %v1712_v6 = vpop.f32.mrb[32].mxu1 }
 0x4c6   :  { %v849_v51 = vmul.f32 0.9, %v1323_v49  ;;  %v784_v54 = vpop.f32.mrb[33].mxu0  ;;  %v832_v55 = vpop.f32.mrb[33].mxu1  ;;  %v861_v41 = vmul.f32 0.9, %v1712_v6 }
 0x4c7   :  { %v847_v57 = vmul.f32 0.9, %v784_v54  ;;  %v1324_v58 = vpop.f32.mrb[34].mxu0  ;;  %v859_v1 = vmul.f32 0.9, %v832_v55  ;;  %v1336_v38 = vpop.f32.mrb[34].mxu1 }
 0x4c8   :  { %v850_v7 = vmul.f32 0.9, %v1324_v58  ;;  %v787_v40 = vpop.f32.mrb[35].mxu0  ;;  %v835_v2 = vpop.f32.mrb[35].mxu1  ;;  %v1715_v3 = vadd.f32 %v849_v51, %v1619_v61  ;;  %v1789_v49 = vadd.f32 %v861_v41, %v1667_v8 }
 0x4c9   :  { %v1718_v4 = vadd.f32 %v847_v57, %v1622_v63  ;;  %v1721_v5 = vadd.f32 %v859_v1, %v1670_v9  ;;  %v860_v59 = vmul.f32 0.9, %v835_v2  ;;  %v848_v62 = vmul.f32 0.9, %v787_v40 }
 0x4ca   :  { %v886_v60 = vsel %vm879_vm2, %v1715_v3, -inf  ;;  %v1726_v42 = vadd.f32 %v850_v7, %v1625_v10 }
 0x4cb   :  { %887 = vmax.xlane.f32.xlu1 %v886_v60  ;;  %v880_v44 = vsel %vm879_vm2, %v1718_v4, -inf  ;;  %v916_v63 = vsel %vm879_vm2, %v1721_v5, -inf  ;;  %v1733_v9 = vadd.f32 %v860_v59, %v1676_v17  ;;  %v1738_v0 = vadd.f32 %v848_v62, %v1628_v13 }
 0x4cc   :  { %881 = vmax.xlane.f32.xlu0 %v880_v44  ;;  %v889_v11 = vsel %vm879_vm2, %v1726_v42, -inf }
 0x4cd   :  { %v1327_v61 = vpop.f32.mrb[36].mxu0  ;;  %v919_v17 = vsel %vm879_vm2, %v1733_v9, -inf  ;;  %v883_v23 = vsel %vm879_vm2, %v1738_v0, -inf }
 0x4ce   :  { %v853_v12 = vmul.f32 0.9, %v1327_v61  ;;  %v800_v14 = vpop.f32.mrb[37].mxu0 }
 0x4cf   :  { %890 = vmax.xlane.f32.xlu1 %v889_v11  ;;  %v1328_v10 = vpop.f32.mrb[38].mxu0  ;;  %v851_v21 = vmul.f32 0.9, %v800_v14 }
 0x4d0   :  { %917 = vmax.xlane.f32.xlu0 %v916_v63  ;;  %v854_v16 = vmul.f32 0.9, %v1328_v10  ;;  %v803_v18 = vpop.f32.mrb[39].mxu0  ;;  %v1741_v46 = vadd.f32 %v853_v12, %v1635_v22 }
 0x4d1   :  { %v852_v20 = vmul.f32 0.9, %v803_v18  ;;  %v1758_v26 = vadd.f32 %v851_v21, %v1638_v24 }
 0x4d2   :  { %v1746_v48 = vadd.f32 %v854_v16, %v1641_v27  ;;  %v898_v25 = vsel %vm879_vm2, %v1741_v46, -inf }
 0x4d3   :  { %920 = vmax.xlane.f32.xlu1 %v919_v17  ;;  %v1753_v50 = vadd.f32 %v852_v20, %v1644_v31  ;;  %v892_v37 = vsel %vm879_vm2, %v1758_v26, -inf }
 0x4d4   :  { %884 = vmax.xlane.f32.xlu0 %v883_v23  ;;  %v901_v13 = vsel %vm879_vm2, %v1746_v48, -inf }
 0x4d5   :  { %v1331_v22 = vpop.f32.mrb[40].mxu0  ;;  %v895_v29 = vsel %vm879_vm2, %v1753_v50, -inf }
 0x4d6   :  { %v857_v19 = vmul.f32 0.9, %v1331_v22  ;;  %v816_v52 = vpop.f32.mrb[41].mxu0 }
 0x4d7   :  { %902 = vmax.xlane.f32.xlu1 %v901_v13  ;;  %v1332_v27 = vpop.f32.mrb[42].mxu0  ;;  %v855_v32 = vmul.f32 0.9, %v816_v52 }
 0x4d8   :  { %899 = vmax.xlane.f32.xlu0 %v898_v25  ;;  %v858_v28 = vmul.f32 0.9, %v1332_v27  ;;  %v819_v33 = vpop.f32.mrb[43].mxu0  ;;  %v1763_v31 = vadd.f32 %v857_v19, %v1651_v43  ;;  %v862_v43 = vmul.f32 0.9, %v1336_v38 }
 0x4d9   :  { %v856_v35 = vmul.f32 0.9, %v819_v33 }
 0x4da   :  { %v1766_v30 = vadd.f32 %v858_v28, %v1657_v53  ;;  %v910_v34 = vsel %vm879_vm2, %v1763_v31, -inf  ;;  %v1779_v53 = vadd.f32 %v855_v32, %v1654_v45  ;;  %v922_v45 = vsel %vm879_vm2, %v1789_v49, -inf }
 0x4db   :  { %896 = vmax.xlane.f32.xlu1 %v895_v29  ;;  %v1771_v24 = vadd.f32 %v856_v35, %v1660_v56  ;;  %v1784_v56 = vadd.f32 %v862_v43, %v1673_v15 }
 0x4dc   :  { %893 = vmax.xlane.f32.xlu0 %v892_v37  ;;  %v913_v39 = vsel %vm879_vm2, %v1766_v30, -inf  ;;  %v904_v47 = vsel %vm879_vm2, %v1779_v53, -inf }
 0x4dd   :  { %v907_v36 = vsel %vm879_vm2, %v1771_v24, -inf  ;;  %v925_v6 = vsel %vm879_vm2, %v1784_v56, -inf }
 0x4df   :  { %914 = vmax.xlane.f32.xlu1 %v913_v39 }
 0x4e0   :  { %911 = vmax.xlane.f32.xlu0 %v910_v34 }
 0x4e3   :  { %908 = vmax.xlane.f32.xlu1 %v907_v36 }
 0x4e4   :  { %905 = vmax.xlane.f32.xlu0 %v904_v47 }
 0x4e7   :  { %926 = vmax.xlane.f32.xlu1 %v925_v6 }
 0x4e8   :  { %923 = vmax.xlane.f32.xlu0 %v922_v45 }
 0x558   :  { %v888_v51 = vpop.xlane.xlu1 %887 }
 0x559   :  { %v1796_v15 = vsub.f32 %v1715_v3, %v888_v51  ;;  %v882_v54 = vpop.xlane.xlu0 %881 }
 0x55a   :  { %v1799_v55 = vsub.f32 %v1718_v4, %v882_v54 }
 0x55b   :  { %v948_v8 = vmul.f32 1.442695, %v1796_v15 }
 0x55c   :  { %v944_v57 = vmul.f32 1.442695, %v1799_v55  ;;  %v891_v58 = vpop.xlane.xlu1 %890 }
 0x55d   :  { %1364 = vpow2.f32 %v948_v8  ;;  %v1804_v1 = vsub.f32 %v1726_v42, %v891_v58  ;;  %v918_v38 = vpop.xlane.xlu0 %917 }
 0x55e   :  { %v1807_v7 = vsub.f32 %v1721_v5, %v918_v38  ;;  %1366 = vpow2.f32 %v944_v57 }
 0x55f   :  { %v950_v40 = vmul.f32 1.442695, %v1804_v1 }
 0x560   :  { %v968_v2 = vmul.f32 1.442695, %v1807_v7  ;;  %v921_v3 = vpop.xlane.xlu1 %920 }
 0x561   :  { %1368 = vpow2.f32 %v950_v40  ;;  %v1812_v4 = vsub.f32 %v1733_v9, %v921_v3  ;;  %v885_v59 = vpop.xlane.xlu0 %884 }
 0x562   :  { %v1815_v60 = vsub.f32 %v1738_v0, %v885_v59  ;;  %1370 = vpow2.f32 %v968_v2 }
 0x563   :  { %v970_v42 = vmul.f32 1.442695, %v1812_v4 }
 0x564   :  { %v946_v5 = vmul.f32 1.442695, %v1815_v60  ;;  %v903_v62 = vpop.xlane.xlu1 %902 }
 0x565   :  { %v1820_v44 = vsub.f32 %v1746_v48, %v903_v62  ;;  %v900_v61 = vpop.xlane.xlu0 %899 }
 0x566   :  { %1372 = vpow2.f32 %v946_v5  ;;  %v1823_v63 = vsub.f32 %v1741_v46, %v900_v61 }
 0x567   :  { %v1365_v9 = vpop.eup %1364  ;;  %v958_v11 = vmul.f32 1.442695, %v1820_v44  ;;  %1374 = vpow2.f32 %v970_v42 }
 0x568   :  { %v956_v12 = vmul.f32 1.442695, %v1823_v63  ;;  %v897_v14 = vpop.xlane.xlu1 %896  ;;  %v982_v10 = vsel %vm879_vm2, %v1365_v9, 0.0  ;;  %v1367_v0 = vpop.eup %1366 }
 0x569   :  { %v1829_v16 = vsub.f32 %v1753_v50, %v897_v14  ;;  %v894_v18 = vpop.xlane.xlu0 %893  ;;  %983 = vadd.xlane.f32.xlu0 %v982_v10  ;;  %v976_v23 = vsel %vm879_vm2, %v1367_v0, 0.0 }
 0x56a   :  { %1376 = vpow2.f32 %v956_v12  ;;  %v1832_v20 = vsub.f32 %v1758_v26, %v894_v18 }
 0x56b   :  { %v1369_v46 = vpop.eup %1368  ;;  %1378 = vpow2.f32 %v958_v11  ;;  %v954_v17 = vmul.f32 1.442695, %v1829_v16 }
 0x56c   :  { %v952_v48 = vmul.f32 1.442695, %v1832_v20  ;;  %v915_v21 = vpop.xlane.xlu1 %914  ;;  %v985_v13 = vsel %vm879_vm2, %v1369_v46, 0.0  ;;  %v1371_v22 = vpop.eup %1370 }
 0x56d   :  { %v1839_v50 = vsub.f32 %v1766_v30, %v915_v21  ;;  %v912_v25 = vpop.xlane.xlu0 %911  ;;  %977 = vadd.xlane.f32.xlu0 %v976_v23  ;;  %986 = vadd.xlane.f32.xlu1 %v985_v13  ;;  %v1012_v29 = vsel %vm879_vm2, %v1371_v22, 0.0 }
 0x56e   :  { %1380 = vpow2.f32 %v952_v48  ;;  %v1842_v19 = vsub.f32 %v1763_v31, %v912_v25 }
 0x56f   :  { %1382 = vpow2.f32 %v954_v17  ;;  %v966_v27 = vmul.f32 1.442695, %v1839_v50 }
 0x570   :  { %v1373_v52 = vpop.eup %1372  ;;  %v964_v26 = vmul.f32 1.442695, %v1842_v19  ;;  %v909_v28 = vpop.xlane.xlu1 %908 }
 0x571   :  { %v1848_v33 = vsub.f32 %v1771_v24, %v909_v28  ;;  %1013 = vadd.xlane.f32.xlu0 %v1012_v29  ;;  %v906_v35 = vpop.xlane.xlu0 %905  ;;  %v979_v30 = vsel %vm879_vm2, %v1373_v52, 0.0  ;;  %v1375_v32 = vpop.eup %1374 }
 0x572   :  { %1384 = vpow2.f32 %v964_v26  ;;  %v1852_v31 = vsub.f32 %v1779_v53, %v906_v35  ;;  %980 = vadd.xlane.f32.xlu1 %v979_v30  ;;  %v1015_v6 = vsel %vm879_vm2, %v1375_v32, 0.0 }
 0x573   :  { %1386 = vpow2.f32 %v966_v27  ;;  %v962_v39 = vmul.f32 1.442695, %v1848_v33 }
 0x574   :  { %v1377_v37 = vpop.eup %1376  ;;  %v960_v34 = vmul.f32 1.442695, %v1852_v31  ;;  %v927_v43 = vpop.xlane.xlu1 %926 }
 0x575   :  { %v1379_v41 = vpop.eup %1378  ;;  %v1857_v24 = vsub.f32 %v1784_v56, %v927_v43  ;;  %v924_v36 = vpop.xlane.xlu0 %923  ;;  %v994_v47 = vsel %vm879_vm2, %v1377_v37, 0.0 }
 0x576   :  { %1388 = vpow2.f32 %v960_v34  ;;  %v1862_v53 = vsub.f32 %v1789_v49, %v924_v36  ;;  %995 = vadd.xlane.f32.xlu0 %v994_v47  ;;  %1016 = vadd.xlane.f32.xlu1 %v1015_v6  ;;  %v997_v8 = vsel %vm879_vm2, %v1379_v41, 0.0 }
 0x577   :  { %1390 = vpow2.f32 %v962_v39  ;;  %v974_v51 = vmul.f32 1.442695, %v1857_v24 }
 0x578   :  { %v1381_v45 = vpop.eup %1380  ;;  %v972_v54 = vmul.f32 1.442695, %v1862_v53 }
 0x579   :  { %v988_v56 = vsel %vm879_vm2, %v1381_v45, 0.0  ;;  %v1383_v57 = vpop.eup %1382 }
 0x57a   :  { %1392 = vpow2.f32 %v972_v54  ;;  %989 = vadd.xlane.f32.xlu0 %v988_v56  ;;  %998 = vadd.xlane.f32.xlu1 %v997_v8  ;;  %v991_v38 = vsel %vm879_vm2, %v1383_v57, 0.0 }
 0x57b   :  { %1394 = vpow2.f32 %v974_v51 }
 0x57c   :  { %v1385_v58 = vpop.eup %1384 }
 0x57d   :  { %v1006_v49 = vsel %vm879_vm2, %v1385_v58, 0.0  ;;  %v1387_v40 = vpop.eup %1386 }
 0x57e   :  { %1007 = vadd.xlane.f32.xlu0 %v1006_v49  ;;  %992 = vadd.xlane.f32.xlu1 %v991_v38  ;;  %v1009_v59 = vsel %vm879_vm2, %v1387_v40, 0.0 }
 0x580   :  { %v1389_v2 = vpop.eup %1388 }
 0x581   :  { %v1000_v3 = vsel %vm879_vm2, %v1389_v2, 0.0  ;;  %v1391_v42 = vpop.eup %1390 }
 0x582   :  { %1001 = vadd.xlane.f32.xlu0 %v1000_v3  ;;  %1010 = vadd.xlane.f32.xlu1 %v1009_v59  ;;  %v1003_v61 = vsel %vm879_vm2, %v1391_v42, 0.0 }
 0x584   :  { %v1393_v5 = vpop.eup %1392 }
 0x585   :  { %v1018_v62 = vsel %vm879_vm2, %v1393_v5, 0.0  ;;  %v1395_v9 = vpop.eup %1394 }
 0x586   :  { %1019 = vadd.xlane.f32.xlu0 %v1018_v62  ;;  %1004 = vadd.xlane.f32.xlu1 %v1003_v61  ;;  %v1021_v11 = vsel %vm879_vm2, %v1395_v9, 0.0 }
 0x58a   :  { %1022 = vadd.xlane.f32.xlu1 %v1021_v11 }
 0x5f6   :  { %v984_v12 = vpop.xlane.xlu0 %983 }
 0x5f7   :  { %1396 = vlog2.f32 %v984_v12 }
 0x5fa   :  { %v978_v14 = vpop.xlane.xlu0 %977  ;;  %v987_v10 = vpop.xlane.xlu1 %986 }
 0x5fb   :  { %1398 = vlog2.f32 %v978_v14 }
 0x5fc   :  { %1400 = vlog2.f32 %v987_v10 }
 0x5fe   :  { %v1014_v0 = vpop.xlane.xlu0 %1013 }
 0x5ff   :  { %1402 = vlog2.f32 %v1014_v0  ;;  %v981_v18 = vpop.xlane.xlu1 %980 }
 0x600   :  { %1404 = vlog2.f32 %v981_v18 }
 0x601   :  { %v1397_v46 = vpop.eup %1396 }
 0x602   :  { %v1029_v17 = vmul.f32 0.6931472, %v1397_v46 }
 0x603   :  { %v996_v48 = vpop.xlane.xlu0 %995  ;;  %v1017_v21 = vpop.xlane.xlu1 %1016 }
 0x604   :  { %v1058_v23 = vsub.f32 %v1796_v15, %v1029_v17  ;;  %1406 = vlog2.f32 %v996_v48 }
 0x605   :  { %v1399_v13 = vpop.eup %1398  ;;  %1408 = vlog2.f32 %v1017_v21 }
 0x606   :  { %v1401_v22 = vpop.eup %1400  ;;  %v1025_v25 = vmul.f32 0.6931472, %v1399_v13  ;;  %1074 = vst.msk [vmem:[%s1961_s6 + $0x10] sm:$0xff] %vm879_vm2, %v1058_v23 }
 0x607   :  { %v1031_v52 = vmul.f32 0.6931472, %v1401_v22  ;;  %v990_v27 = vpop.xlane.xlu0 %989  ;;  %v999_v26 = vpop.xlane.xlu1 %998 }
 0x608   :  { %v1056_v28 = vsub.f32 %v1799_v55, %v1025_v25  ;;  %1410 = vlog2.f32 %v990_v27 }
 0x609   :  { %v1403_v29 = vpop.eup %1402  ;;  %v1059_v35 = vsub.f32 %v1804_v1, %v1031_v52  ;;  %1412 = vlog2.f32 %v999_v26 }
 0x60a   :  { %v1405_v15 = vpop.eup %1404  ;;  %v1049_v30 = vmul.f32 0.6931472, %v1403_v29  ;;  %1072 = vst.msk [vmem:[%s1961_s6] sm:$0xff] %vm879_vm2, %v1056_v28 }
 0x60b   :  { %v1027_v32 = vmul.f32 0.6931472, %v1405_v15  ;;  %1075 = vst.msk [vmem:[%s1961_s6 + $0x18] sm:$0xff] %vm879_vm2, %v1059_v35  ;;  %v1008_v37 = vpop.xlane.xlu0 %1007  ;;  %v993_v55 = vpop.xlane.xlu1 %992 }
 0x60c   :  { %v1068_v39 = vsub.f32 %v1807_v7, %v1049_v30  ;;  %1414 = vlog2.f32 %v1008_v37 }
 0x60d   :  { %v1057_v1 = vsub.f32 %v1815_v60, %v1027_v32  ;;  %1416 = vlog2.f32 %v993_v55 }
 0x60e   :  { %v1407_v34 = vpop.eup %1406  ;;  %1084 = vst.msk [vmem:[%s1961_s6 + $0x60] sm:$0xff] %vm879_vm2, %v1068_v39 }
 0x60f   :  { %v1409_v43 = vpop.eup %1408  ;;  %v1037_v41 = vmul.f32 0.6931472, %v1407_v34  ;;  %1073 = vst.msk [vmem:[%s1961_s6 + $0x8] sm:$0xff] %vm879_vm2, %v1057_v1  ;;  %v1002_v36 = vpop.xlane.xlu0 %1001 }
 0x610   :  { %v1011_v47 = vpop.xlane.xlu1 %1010  ;;  %v1051_v7 = vmul.f32 0.6931472, %v1409_v43  ;;  %1418 = vlog2.f32 %v1002_v36 }
 0x611   :  { %v1062_v60 = vsub.f32 %v1823_v63, %v1037_v41  ;;  %1420 = vlog2.f32 %v1011_v47 }
 0x612   :  { %v1411_v6 = vpop.eup %1410  ;;  %v1069_v45 = vsub.f32 %v1812_v4, %v1051_v7 }
 0x613   :  { %v1413_v51 = vpop.eup %1412  ;;  %1078 = vst.msk [vmem:[%s1961_s6 + $0x30] sm:$0xff] %vm879_vm2, %v1062_v60  ;;  %v1033_v54 = vmul.f32 0.6931472, %v1411_v6  ;;  %v1020_v56 = vpop.xlane.xlu0 %1019 }
 0x614   :  { %v1005_v8 = vpop.xlane.xlu1 %1004  ;;  %1085 = vst.msk [vmem:[%s1961_s6 + $0x68] sm:$0xff] %vm879_vm2, %v1069_v45  ;;  %v1039_v57 = vmul.f32 0.6931472, %v1413_v51  ;;  %1422 = vlog2.f32 %v1020_v56 }
 0x615   :  { %v1060_v63 = vsub.f32 %v1832_v20, %v1033_v54  ;;  %1424 = vlog2.f32 %v1005_v8 }
 0x616   :  { %v1415_v4 = vpop.eup %1414  ;;  %v1063_v58 = vsub.f32 %v1820_v44, %v1039_v57 }
 0x617   :  { %v1417_v49 = vpop.eup %1416  ;;  %1076 = vst.msk [vmem:[%s1961_s6 + $0x20] sm:$0xff] %vm879_vm2, %v1060_v63  ;;  %v1045_v38 = vmul.f32 0.6931472, %v1415_v4 }
 0x618   :  { %v1023_v40 = vpop.xlane.xlu1 %1022  ;;  %1079 = vst.msk [vmem:[%s1961_s6 + $0x38] sm:$0xff] %vm879_vm2, %v1063_v58  ;;  %v1035_v2 = vmul.f32 0.6931472, %v1417_v49 }
 0x619   :  { %1426 = vlog2.f32 %v1023_v40  ;;  %v1066_v20 = vsub.f32 %v1842_v19, %v1045_v38 }
 0x61a   :  { %v1419_v3 = vpop.eup %1418  ;;  %v1061_v44 = vsub.f32 %v1829_v16, %v1035_v2 }
 0x61b   :  { %v1421_v59 = vpop.eup %1420  ;;  %1082 = vst.msk [vmem:[%s1961_s6 + $0x50] sm:$0xff] %vm879_vm2, %v1066_v20  ;;  %v1041_v42 = vmul.f32 0.6931472, %v1419_v3 }
 0x61c   :  { %1077 = vst.msk [vmem:[%s1961_s6 + $0x28] sm:$0xff] %vm879_vm2, %v1061_v44  ;;  %v1047_v5 = vmul.f32 0.6931472, %v1421_v59 }
 0x61d   :  { %v1064_v62 = vsub.f32 %v1852_v31, %v1041_v42 }
 0x61e   :  { %v1423_v61 = vpop.eup %1422  ;;  %v1067_v19 = vsub.f32 %v1839_v50, %v1047_v5 }
 0x61f   :  { %v1425_v9 = vpop.eup %1424  ;;  %1080 = vst.msk [vmem:[%s1961_s6 + $0x40] sm:$0xff] %vm879_vm2, %v1064_v62  ;;  %v1053_v16 = vmul.f32 0.6931472, %v1423_v61 }
 0x620   :  { %1083 = vst.msk [vmem:[%s1961_s6 + $0x58] sm:$0xff] %vm879_vm2, %v1067_v19  ;;  %v1043_v11 = vmul.f32 0.6931472, %v1425_v9 }
 0x621   :  { %v1070_v12 = vsub.f32 %v1862_v53, %v1053_v16 }
 0x622   :  { %v1065_v31 = vsub.f32 %v1848_v33, %v1043_v11 }
 0x623   :  { %v1427_v14 = vpop.eup %1426  ;;  %1086 = vst.msk [vmem:[%s1961_s6 + $0x70] sm:$0xff] %vm879_vm2, %v1070_v12 }
 0x624   :  { %v1055_v50 = vmul.f32 0.6931472, %v1427_v14  ;;  %1081 = vst.msk [vmem:[%s1961_s6 + $0x48] sm:$0xff] %vm879_vm2, %v1065_v31 }
 0x626   :  { %v1071_v10 = vsub.f32 %v1857_v24, %v1055_v50 }
 0x628   :  { %1087 = vst.msk [vmem:[%s1961_s6 + $0x78] sm:$0xff] %vm879_vm2, %v1071_v10 }
 0x629   :  { %1092 = vsyncmov [#allocation3] }
 0x62c   :  { %s1093_s11 = vpop.sfrf %1092 }
 0x62d   :  { %p1135_p0 = scmp.ne.s32.totalorder %s1093_s11, 0 }
 0x62f   :  { %1097 = shalt.err (%p1135_p0)  }

</bundles_post_ra>
